<compile_context>
chip_gen: v7x
topology: tpu7x:2x2x1
jax: 0.10.0
libtpu: 0.0.40
codegen_flags: <defaults>
</compile_context>

<pallas_src>
import functools

import jax
import jax.numpy as jnp
from jax.experimental import pallas as pl
from jax.experimental.pallas import tpu as pltpu


def _ffn_kernel(seed_ref, x_ref, w1_ref, b1_ref, w2_ref, b2_ref, out_ref,
                *, dropout_rate, training):
    # Load tile in native dtype, compute in f32.
    x = x_ref[...].astype(jnp.float32)                       # (TM, Dc)
    w1 = w1_ref[...].astype(jnp.float32)                     # (Dc, Dh)
    b1 = b1_ref[...].astype(jnp.float32)                     # (1, Dh)
    w2 = w2_ref[...].astype(jnp.float32)                     # (Dh, Dc)
    b2 = b2_ref[...].astype(jnp.float32)                     # (1, Dc)

    h = jnp.dot(x, w1,
                precision=jax.lax.Precision.HIGHEST,
                preferred_element_type=jnp.float32) + b1     # (TM, Dh)

    # tanh-approx GELU (VPU + EUP work, hides under DMA).
    c = 0.7978845608028654  # sqrt(2/pi)
    h = 0.5 * h * (1.0 + jnp.tanh(c * (h + 0.044715 * h * h * h)))

    if training and dropout_rate > 0.0:
        # Per-tile seed so every grid step draws an independent stream.
        pltpu.prng_seed(seed_ref[0] + pl.program_id(0))
        keep_scale = 1.0 / (1.0 - dropout_rate)
        thresh = jnp.uint32(min(int((1.0 - dropout_rate) * 4294967296.0),
                                4294967295))
        bits1 = pltpu.bitcast(pltpu.prng_random_bits(h.shape), jnp.uint32)
        h = jnp.where(bits1 < thresh, h * keep_scale, 0.0)

    y = jnp.dot(h, w2,
                precision=jax.lax.Precision.HIGHEST,
                preferred_element_type=jnp.float32) + b2     # (TM, Dc)

    if training and dropout_rate > 0.0:
        keep_scale = 1.0 / (1.0 - dropout_rate)
        thresh = jnp.uint32(min(int((1.0 - dropout_rate) * 4294967296.0),
                                4294967295))
        bits2 = pltpu.bitcast(pltpu.prng_random_bits(y.shape), jnp.uint32)
        y = jnp.where(bits2 < thresh, y * keep_scale, 0.0)

    out_ref[...] = y.astype(out_ref.dtype)


def _round_up(n, m):
    return ((n + m - 1) // m) * m


def feed_forward(x, w1, b1, w2, b2, *, dropout_rate=0.1, training=False,
                 seed=0, block_rows=256):
    """Fused FeedForward forward pass. x: (..., caps_dim)."""
    caps_dim, hidden_dim = w1.shape
    orig_shape = x.shape
    x2d = x.reshape(-1, caps_dim)                            # (M, Dc) native dtype
    m = x2d.shape[0]

    # Row tile: multiple of 8 (sublane), capped by block_rows; last dims of all
    # blocks are the full model dims (so the (8,128) rule is satisfied).
    tm = min(block_rows, _round_up(m, 8))
    m_pad = _round_up(m, tm)
    if m_pad != m:
        x2d = jnp.pad(x2d, ((0, m_pad - m), (0, 0)))

    seed_arr = jnp.asarray([seed], dtype=jnp.int32)
    b1_2d = b1.reshape(1, hidden_dim)
    b2_2d = b2.reshape(1, caps_dim)

    kernel = functools.partial(_ffn_kernel,
                               dropout_rate=float(dropout_rate),
                               training=bool(training))

    out = pl.pallas_call(
        kernel,
        out_shape=jax.ShapeDtypeStruct((m_pad, caps_dim), x.dtype),
        grid_spec=pltpu.PrefetchScalarGridSpec(
            num_scalar_prefetch=1,                           # seed -> SMEM
            grid=(m_pad // tm,),
            in_specs=[
                pl.BlockSpec((tm, caps_dim), lambda i, *_: (i, 0)),          # x tile
                pl.BlockSpec((caps_dim, hidden_dim), lambda i, *_: (0, 0)),  # W1 resident
                pl.BlockSpec((1, hidden_dim), lambda i, *_: (0, 0)),         # b1 resident
                pl.BlockSpec((hidden_dim, caps_dim), lambda i, *_: (0, 0)),  # W2 resident
                pl.BlockSpec((1, caps_dim), lambda i, *_: (0, 0)),           # b2 resident
            ],
            out_specs=pl.BlockSpec((tm, caps_dim), lambda i, *_: (i, 0)),
        ),
        compiler_params=pltpu.CompilerParams(
            dimension_semantics=("parallel",),               # megacore on v7x
        ),
    )(seed_arr, x2d, w1, b1_2d, w2, b2_2d)

    return out[:m].reshape(orig_shape)


def _reference(x, w1, b1, w2, b2):
    # Eval-mode FeedForward (dropout = identity), tanh-approx GELU.
    h = jnp.dot(x, w1, precision=jax.lax.Precision.HIGHEST) + b1
    c = 0.7978845608028654
    h = 0.5 * h * (1.0 + jnp.tanh(c * (h + 0.044715 * h * h * h)))
    return jnp.dot(h, w2, precision=jax.lax.Precision.HIGHEST) + b2


if __name__ == "__main__":
    key = jax.random.PRNGKey(0)
    kx, k1, k2, k3, k4 = jax.random.split(key, 5)

    B, S, caps_dim, hidden_dim = 2, 8, 16, 32
    x = jax.random.normal(kx, (B, S, caps_dim), dtype=jnp.float32)
    w1 = jax.random.normal(k1, (caps_dim, hidden_dim), dtype=jnp.float32) * (caps_dim ** -0.5)
    b1 = jax.random.normal(k2, (hidden_dim,), dtype=jnp.float32) * 0.01
    w2 = jax.random.normal(k3, (hidden_dim, caps_dim), dtype=jnp.float32) * (hidden_dim ** -0.5)
    b2 = jax.random.normal(k4, (caps_dim,), dtype=jnp.float32) * 0.01

    # Eval-mode forward (dropout disabled) so the result is deterministic.
    out = feed_forward(x, w1, b1, w2, b2, dropout_rate=0.1, training=False)
    out = jax.block_until_ready(out)

    ref = _reference(x, w1, b1, w2, b2)
    assert out.shape == x.shape, (out.shape, x.shape)
    assert jnp.allclose(out, ref, rtol=1e-5, atol=1e-5), (out, ref)

    print("KERNEL_OK")
</pallas_src>

<mosaic_0001>
module attributes {stable_mosaic.version = 11 : i64} {
  func.func @_ffn_kernel(%arg0: i32, %arg1: memref<1xi32, #tpu.memory_space<smem>>, %arg2: memref<16x16xf32, #tpu.memory_space<vmem>>, %arg3: memref<16x32xf32, #tpu.memory_space<vmem>>, %arg4: memref<1x32xf32, #tpu.memory_space<vmem>>, %arg5: memref<32x16xf32, #tpu.memory_space<vmem>>, %arg6: memref<1x16xf32, #tpu.memory_space<vmem>>, %arg7: memref<16x16xf32, #tpu.memory_space<vmem>>) attributes {dimension_semantics = [#tpu.dimension_semantics<parallel>], iteration_bounds = array<i64: 1>, scalar_prefetch = 1 : i64, scratch_operands = 0 : i64, tpu.core_type = #tpu.core_type<tc>, window_params = [{transform_indices = @transform_0, window_bounds = array<i64: 16, 16>}, {pipeline_mode = #tpu.pipeline_mode<synchronous>, transform_indices = @transform_1, window_bounds = array<i64: 16, 32>}, {pipeline_mode = #tpu.pipeline_mode<synchronous>, transform_indices = @transform_2, window_bounds = array<i64: 1, 32>}, {pipeline_mode = #tpu.pipeline_mode<synchronous>, transform_indices = @transform_3, window_bounds = array<i64: 32, 16>}, {pipeline_mode = #tpu.pipeline_mode<synchronous>, transform_indices = @transform_4, window_bounds = array<i64: 1, 16>}, {transform_indices = @transform_5, window_bounds = array<i64: 16, 16>}]} {
    %c0 = arith.constant 0 : index
    %c0_0 = arith.constant 0 : index
    %0 = vector.load %arg2[%c0, %c0_0] : memref<16x16xf32, #tpu.memory_space<vmem>>, vector<16x16xf32>
    %c0_1 = arith.constant 0 : index
    %c0_2 = arith.constant 0 : index
    %1 = vector.load %arg3[%c0_1, %c0_2] : memref<16x32xf32, #tpu.memory_space<vmem>>, vector<16x32xf32>
    %c0_3 = arith.constant 0 : index
    %c0_4 = arith.constant 0 : index
    %2 = vector.load %arg4[%c0_3, %c0_4] : memref<1x32xf32, #tpu.memory_space<vmem>>, vector<1x32xf32>
    %c0_5 = arith.constant 0 : index
    %c0_6 = arith.constant 0 : index
    %3 = vector.load %arg5[%c0_5, %c0_6] : memref<32x16xf32, #tpu.memory_space<vmem>>, vector<32x16xf32>
    %c0_7 = arith.constant 0 : index
    %c0_8 = arith.constant 0 : index
    %4 = vector.load %arg6[%c0_7, %c0_8] : memref<1x16xf32, #tpu.memory_space<vmem>>, vector<1x16xf32>
    %cst = arith.constant dense<0.000000e+00> : vector<16x32xf32>
    %5 = tpu.matmul %0, %1, %cst {dimension_numbers = #tpu.dot_dimension_numbers<[1], [0], [0], [1], [0, 0, 1, 1], [], []>, precision = #tpu.contract_precision<fp32>} : vector<16x16xf32>, vector<16x32xf32>, vector<16x32xf32> -> vector<16x32xf32>
    %6 = vector.broadcast %2 : vector<1x32xf32> to vector<16x32xf32>
    %7 = arith.addf %5, %6 : vector<16x32xf32>
    %cst_9 = arith.constant 5.000000e-01 : f32
    %8 = vector.broadcast %cst_9 : f32 to vector<16x32xf32>
    %9 = arith.mulf %8, %7 : vector<16x32xf32>
    %cst_10 = arith.constant 4.471500e-02 : f32
    %10 = vector.broadcast %cst_10 : f32 to vector<16x32xf32>
    %11 = arith.mulf %10, %7 : vector<16x32xf32>
    %12 = arith.mulf %11, %7 : vector<16x32xf32>
    %13 = arith.mulf %12, %7 : vector<16x32xf32>
    %14 = arith.addf %7, %13 : vector<16x32xf32>
    %cst_11 = arith.constant 0.797884583 : f32
    %15 = vector.broadcast %cst_11 : f32 to vector<16x32xf32>
    %16 = arith.mulf %15, %14 : vector<16x32xf32>
    %17 = math.tanh %16 : vector<16x32xf32>
    %cst_12 = arith.constant 1.000000e+00 : f32
    %18 = vector.broadcast %cst_12 : f32 to vector<16x32xf32>
    %19 = arith.addf %18, %17 : vector<16x32xf32>
    %20 = arith.mulf %9, %19 : vector<16x32xf32>
    %cst_13 = arith.constant dense<0.000000e+00> : vector<16x16xf32>
    %21 = tpu.matmul %20, %3, %cst_13 {dimension_numbers = #tpu.dot_dimension_numbers<[1], [0], [0], [1], [0, 0, 1, 1], [], []>, precision = #tpu.contract_precision<fp32>} : vector<16x32xf32>, vector<32x16xf32>, vector<16x16xf32> -> vector<16x16xf32>
    %22 = vector.broadcast %4 : vector<1x16xf32> to vector<16x16xf32>
    %23 = arith.addf %21, %22 : vector<16x16xf32>
    %c0_14 = arith.constant 0 : index
    %c0_15 = arith.constant 0 : index
    %24 = vector.load %arg7[%c0_14, %c0_15] : memref<16x16xf32, #tpu.memory_space<vmem>>, vector<16x16xf32>
    tpu.vector_store %arg7[%c0_14, %c0_15], %23 {strides = array<i32>} : memref<16x16xf32, #tpu.memory_space<vmem>>, vector<16x16xf32>,
    return
  }
  func.func @transform_0(%arg0: i32, %arg1: memref<1xi32, #tpu.memory_space<smem>>) -> (i32, i32) {
    %c0_i32 = arith.constant 0 : i32
    %c0_i32_0 = arith.constant 0 : i32
    return %arg0, %c0_i32 : i32, i32
  }
  func.func @transform_1(%arg0: i32, %arg1: memref<1xi32, #tpu.memory_space<smem>>) -> (i32, i32) {
    %c0_i32 = arith.constant 0 : i32
    %c0_i32_0 = arith.constant 0 : i32
    %c0_i32_1 = arith.constant 0 : i32
    return %c0_i32, %c0_i32_0 : i32, i32
  }
  func.func @transform_2(%arg0: i32, %arg1: memref<1xi32, #tpu.memory_space<smem>>) -> (i32, i32) {
    %c0_i32 = arith.constant 0 : i32
    %c0_i32_0 = arith.constant 0 : i32
    %c0_i32_1 = arith.constant 0 : i32
    return %c0_i32, %c0_i32_0 : i32, i32
  }
  func.func @transform_3(%arg0: i32, %arg1: memref<1xi32, #tpu.memory_space<smem>>) -> (i32, i32) {
    %c0_i32 = arith.constant 0 : i32
    %c0_i32_0 = arith.constant 0 : i32
    %c0_i32_1 = arith.constant 0 : i32
    return %c0_i32, %c0_i32_0 : i32, i32
  }
  func.func @transform_4(%arg0: i32, %arg1: memref<1xi32, #tpu.memory_space<smem>>) -> (i32, i32) {
    %c0_i32 = arith.constant 0 : i32
    %c0_i32_0 = arith.constant 0 : i32
    %c0_i32_1 = arith.constant 0 : i32
    return %c0_i32, %c0_i32_0 : i32, i32
  }
  func.func @transform_5(%arg0: i32, %arg1: memref<1xi32, #tpu.memory_space<smem>>) -> (i32, i32) {
    %c0_i32 = arith.constant 0 : i32
    %c0_i32_0 = arith.constant 0 : i32
    return %arg0, %c0_i32 : i32, i32
  }
}

</mosaic_0001>

<bundles_post_ra>
// kernel: tpu_custom_call.1
= control target key start
LH: loop header
LB: loop body
LE: loop exit
PB: predicated region body
PF: predicated region fallthrough
CT: control target
= control target key end

     0   :  { %vm39_vm0 = vcmask 130048   ;;  %s1522_s0 = inlined_call_operand.<no memory space> [shape: s32[1], index: 0, kind: input, shape index: {}]   ;;  %s1523_s1 = inlined_call_operand.vmem [shape: f32[16,16], index: 1, kind: input, shape index: {}]   ;;  %s1524_s2 = inlined_call_operand.vmem [shape: f32[16,32], index: 2, kind: input, shape index: {}]   ;;  %s1525_s3 = inlined_call_operand.vmem [shape: f32[1,32], index: 3, kind: input, shape index: {}]   ;;  %s1526_s4 = inlined_call_operand.vmem [shape: f32[32,16], index: 4, kind: input, shape index: {}]   ;;  %s1527_s5 = inlined_call_operand.vmem [shape: f32[1,16], index: 5, kind: input, shape index: {}]   ;;  %s1528_s6 = inlined_call_operand.hbm [shape: f32[16,16], index: 6, kind: output, shape index: {}]  }
   0x1   :  { %v25_v0 = vld [vmem:[%s1524_s2] sm:$0xff]  ;;  %v26_v1 = vld [vmem:[%s1524_s2 + $0x8] sm:$0xff] }
   0x2   :  { %v23_v2 = vld [vmem:[%s1523_s1] sm:$0xff]  ;;  %v47_v3 = vand.u32 4294901760, %v25_v0  ;;  %v50_v4 = vand.u32 4294901760, %v26_v1  ;;  %v24_v6 = vld [vmem:[%s1523_s1 + $0x8] sm:$0xff] }
   0x3   :  { %v41_v5 = vsel %vm39_vm0, %v23_v2, 0  ;;  %v44_v8 = vsel %vm39_vm0, %v24_v6, 0 }
   0x4   :  { %v113_v7 = vand.u32 4294901760, %v41_v5 }
   0x5   :  { %12 = vsyncpa [#allocation5], 0  ;;  %v1295_v9 = vpack.c.bf16 %v50_v4, %v47_v3  ;;  %v123_v10 = vand.u32 4294901760, %v44_v8  ;;  %v135_v11 = vsub.f32 %v25_v0, %v47_v3  ;;  %v142_v12 = vsub.f32 %v26_v1, %v50_v4  ;;  %v28_v30 = vld [vmem:[%s1526_s4] sm:$0xff]  ;;  %v29_v31 = vld [vmem:[%s1526_s4 + $0x8] sm:$0xff]  ;;  %s1422_s12 = smov [#allocation4]  }
   0x6   :  { %v114_v13 = vsub.f32 %v41_v5, %v113_v7  ;;  %v580_v32 = vand.u32 4294901760, %v28_v30  ;;  %v583_v33 = vand.u32 4294901760, %v29_v31  ;;  %v30_v34 = vld [vmem:[%s1526_s4 + $0x10] sm:$0xff]  ;;  %v31_v35 = vld [vmem:[%s1526_s4 + $0x18] sm:$0xff]  ;;  %v1125_v62 = vld [vmem:[%s1525_s3] ss:$0 sm:$0xff] }
   0x7   :  { %1296 = vmatprep.subr.bf16.mxu0 %v1295_v9  ;;  %v124_v14 = vsub.f32 %v44_v8, %v123_v10  ;;  %v136_v15 = vand.u32 4294901760, %v135_v11  ;;  %v143_v16 = vand.u32 4294901760, %v142_v12  ;;  %v1303_v28 = vpack.c.bf16 %v142_v12, %v135_v11  ;;  %s1114_s13 = sshll.u32 %s1422_s12, 4  ;;  %s1115_s13 = int_to_ptr.vmem [resolvable:$true] %s1114_s13 }
   0x8   :  { %1298 = vmatpush3.bf16.msra.mxu0 %v1295_v9  ;;  %v115_v17 = vand.u32 4294901760, %v114_v13  ;;  %v1486_v36 = vpack.c.bf16 %v583_v33, %v580_v32  ;;  %v670_v37 = vsub.f32 %v28_v30, %v580_v32  ;;  %v677_v38 = vsub.f32 %v29_v31, %v583_v33  ;;  %s1398_s14 = scalar_lea.vmem %s1115_s13, 256  ;;  %p1403_p1 = scmp.lt.s32.totalorder %s1115_s13, %s1115_s13 }
   0x9   :  { %v125_v18 = vand.u32 4294901760, %v124_v14  ;;  %v137_v19 = vsub.f32 %v135_v11, %v136_v15  ;;  %v144_v20 = vsub.f32 %v142_v12, %v143_v16  ;;  %v1311_v29 = vpack.c.bf16 %v143_v16, %v136_v15  ;;  %p1399_p0 = scmp.ne.s32.totalorder %s1115_s13, %s1398_s14  ;;  %p1404_p2 = scmp.lt.s32.totalorder %s1398_s14, %s1398_s14 }
   0xa   :  { %v116_v21 = vsub.f32 %v114_v13, %v115_v17  ;;  %v586_v39 = vand.u32 4294901760, %v30_v34  ;;  %v589_v40 = vand.u32 4294901760, %v31_v35  ;;  %v671_v41 = vand.u32 4294901760, %v670_v37 }
   0xb   :  { %v126_v22 = vsub.f32 %v124_v14, %v125_v18  ;;  %v138_v23 = vand.u32 4294901760, %v137_v19  ;;  %v145_v24 = vand.u32 4294901760, %v144_v20  ;;  %v678_v42 = vand.u32 4294901760, %v677_v38  ;;  %p1405_p3 = por %p1404_p2, %p1403_p1 }
   0xc   :  { %v117_v25 = vand.u32 4294901760, %v116_v21  ;;  %v684_v43 = vsub.f32 %v30_v34, %v586_v39  ;;  %v1489_v44 = vpack.c.bf16 %v589_v40, %v586_v39  ;;  %v691_v45 = vsub.f32 %v31_v35, %v589_v40  ;;  %v1126_v35 = vld [vmem:[%s1527_s5] ss:$0 sm:$0xff] }
   0xd   :  { %v127_v26 = vand.u32 4294901760, %v126_v22  ;;  %v1299_v27 = vpack.c.bf16 %v145_v24, %v138_v23  ;;  %v672_v46 = vsub.f32 %v670_v37, %v671_v41  ;;  %v679_v47 = vsub.f32 %v677_v38, %v678_v42  ;;  %p1406_p4 = pnand %p1405_p3, %p1399_p0 }
   0xe   :  { %1191 = vmatprep.mubr.f32.mxu0 %v117_v25  ;;  %v685_v48 = vand.u32 4294901760, %v684_v43  ;;  %v692_v49 = vand.u32 4294901760, %v691_v45  ;;  %v1335_v58 = vpack.c.bf16 %v677_v38, %v670_v37  ;;  %v1339_v59 = vpack.c.bf16 %v691_v45, %v684_v43 }
   0xf   :  { %1192 = vmatmul.mubr.f32.vlgmr.msra.gmra.mrb[0].mxu0 %v127_v26  ;;  %1300 = vmatprep.subr.bf16.mxu0 %v1299_v27  ;;  %v673_v50 = vand.u32 4294901760, %v672_v46  ;;  %v680_v51 = vand.u32 4294901760, %v679_v47  ;;  %v1351_v60 = vpack.c.bf16 %v678_v42, %v671_v41  ;;  %vm572_vm1 = vcmask 261120  }
  0x10   :  { %1302 = vmatpush3.bf16.msra.mxu0 %v1299_v27  ;;  %1198 = vmatprep.mubr.f32.mxu0 %v113_v7  ;;  %v686_v52 = vsub.f32 %v684_v43, %v685_v48  ;;  %v693_v53 = vsub.f32 %v691_v45, %v692_v49  ;;  %v1355_v61 = vpack.c.bf16 %v692_v49, %v685_v48 }
  0x11   :  { %1304 = vmatprep.subr.bf16.mxu0 %v1303_v28  ;;  %v1327_v54 = vpack.c.bf16 %v680_v51, %v673_v50 }
  0x12   :  { %v687_v55 = vand.u32 4294901760, %v686_v52  ;;  %v694_v56 = vand.u32 4294901760, %v693_v53 }
  0x13   :  { %1328 = vmatprep.subr.bf16.mxu1 %v1327_v54 }
  0x14   :  { %1330 = vmatpush3.bf16.msra.mxu1 %v1327_v54  ;;  %v1331_v57 = vpack.c.bf16 %v694_v56, %v687_v55 }
  0x16   :  { %1332 = vmatprep.subr.bf16.mxu1 %v1331_v57 }
  0x17   :  { %1199 = vmatmul.mubr.f32.vlgmr.msra.gmra.mrb[0].mxu0 %v123_v10 }
  0x18   :  { %1306 = vmatpush3.bf16.msra.mxu0 %v1303_v28  ;;  %1205 = vmatprep.mubr.f32.mxu0 %v114_v13 }
  0x19   :  { %1308 = vmatprep.subr.bf16.mxu0 %v1295_v9  ;;  %1334 = vmatpush3.bf16.msra.mxu1 %v1331_v57 }
  0x1a   :  { %1336 = vmatprep.subr.bf16.mxu1 %v1335_v58 }
  0x1f   :  { %1206 = vmatmul.mubr.f32.vlgmr.msra.gmra.mrb[0].mxu0 %v124_v14 }
  0x20   :  { %1310 = vmatpush3.bf16.msra.mxu0 %v1295_v9  ;;  %1212 = vmatprep.mubr.f32.mxu0 %v115_v17 }
  0x21   :  { %1312 = vmatprep.subr.bf16.mxu0 %v1311_v29 }
  0x27   :  { %1213 = vmatmul.mubr.f32.vlgmr.msra.gmra.mrb[0].mxu0 %v125_v18 }
  0x28   :  { %1314 = vmatpush3.bf16.msra.mxu0 %v1311_v29  ;;  %1219 = vmatprep.mubr.f32.mxu0 %v113_v7 }
  0x29   :  { %1316 = vmatprep.subr.bf16.mxu0 %v1295_v9 }
  0x2f   :  { %1220 = vmatmul.mubr.f32.vlgmr.msra.gmra.mrb[0].mxu0 %v123_v10 }
  0x30   :  { %1318 = vmatpush3.bf16.msra.mxu0 %v1295_v9  ;;  %1226 = vmatprep.mubr.f32.mxu0 %v113_v7 }
  0x31   :  { %1320 = vmatprep.subr.bf16.mxu0 %v1486_v36 }
  0x37   :  { %1227 = vmatmul.mubr.f32.vlgmr.msra.gmra.mrb[0].mxu0 %v123_v10 }
  0x38   :  { %1322 = vmatpush3.bf16.msra.mxu0 %v1486_v36 }
  0x39   :  { %1324 = vmatprep.subr.bf16.mxu0 %v1489_v44 }
  0x3c   :  { %1326 = vmatpush3.bf16.msra.mxu0 %v1489_v44 }
 0x10a   :  { %v1228_v63 = vpop.f32.mrb[0].mxu0 }
 0x10b   :  { %v1367_v0 = vadd.f32 %v1228_v63, %v1125_v62  ;;  %v538_v1 = vpop.f32.mrb[1].mxu0 }
 0x10c   :  { %v1368_v2 = vadd.f32 %v1125_v62, %v538_v1 }
 0x10d   :  { %v551_v3 = vmul.f32 0.044715, %v1367_v0  ;;  %v549_v15 = vmul.f32 0.5, %v1367_v0 }
 0x10e   :  { %v550_v4 = vmul.f32 0.044715, %v1368_v2  ;;  %v548_v17 = vmul.f32 0.5, %v1368_v2 }
 0x10f   :  { %v553_v5 = vmul.f32 %v1367_v0, %v551_v3 }
 0x110   :  { %v552_v6 = vmul.f32 %v1368_v2, %v550_v4 }
 0x111   :  { %v555_v7 = vmul.f32 %v1367_v0, %v553_v5 }
 0x112   :  { %v554_v8 = vmul.f32 %v1368_v2, %v552_v6 }
 0x113   :  { %v557_v9 = vadd.f32 %v1367_v0, %v555_v7 }
 0x114   :  { %v556_v10 = vadd.f32 %v1368_v2, %v554_v8 }
 0x115   :  { %v559_v11 = vmul.f32 0.7978846, %v557_v9 }
 0x116   :  { %v558_v12 = vmul.f32 0.7978846, %v556_v10 }
 0x117   :  { %1394 = vtanh.f32 %v559_v11 }
 0x118   :  { %1396 = vtanh.f32 %v558_v12 }
 0x121   :  { %v1395_v13 = vpop.eup %1394 }
 0x122   :  { %v1397_v14 = vpop.eup %1396  ;;  %v563_v16 = vadd.f32 1.0, %v1395_v13 }
 0x123   :  { %v562_v18 = vadd.f32 1.0, %v1397_v14 }
 0x124   :  { %v565_v19 = vmul.f32 %v563_v16, %v549_v15 }
 0x125   :  { %v564_v20 = vmul.f32 %v562_v18, %v548_v17 }
 0x126   :  { %v577_v21 = vsel %vm572_vm1, %v565_v19, 0 }
 0x127   :  { %v574_v22 = vsel %vm572_vm1, %v564_v20, 0  ;;  %v658_v23 = vand.u32 4294901760, %v577_v21 }
 0x128   :  { %v648_v24 = vand.u32 4294901760, %v574_v22 }
 0x129   :  { %v659_v25 = vsub.f32 %v577_v21, %v658_v23 }
 0x12a   :  { %1248 = vmatprep.mubr.f32.mxu1 %v648_v24  ;;  %v649_v26 = vsub.f32 %v574_v22, %v648_v24 }
 0x12b   :  { %1249 = vmatmul.mubr.f32.vlgmr.msra.gmra.mrb[0].mxu1 %v658_v23  ;;  %v660_v27 = vand.u32 4294901760, %v659_v25 }
 0x12c   :  { %1338 = vmatpush3.bf16.msra.mxu1 %v1335_v58  ;;  %1259 = vmatprep.mubr.f32.mxu1 %v649_v26  ;;  %v650_v28 = vand.u32 4294901760, %v649_v26 }
 0x12d   :  { %1340 = vmatprep.subr.bf16.mxu1 %v1339_v59  ;;  %v661_v29 = vsub.f32 %v659_v25, %v660_v27 }
 0x12e   :  { %v651_v30 = vsub.f32 %v649_v26, %v650_v28 }
 0x12f   :  { %v662_v32 = vand.u32 4294901760, %v661_v29 }
 0x130   :  { %1342 = vmatpush3.bf16.msra.mxu1 %v1339_v59  ;;  %v652_v31 = vand.u32 4294901760, %v651_v30 }
 0x131   :  { %1344 = vmatprep.subr.bf16.mxu1 %v1486_v36 }
 0x132   :  { %1237 = vmatprep.mubr.f32.mxu0 %v652_v31 }
 0x133   :  { %1238 = vmatmul.mubr.f32.vlgmr.msra.gmra.mrb[2].mxu0 %v662_v32  ;;  %1260 = vmatmul.mubr.f32.vlgmr.msra.gmra.mrb[0].mxu1 %v659_v25 }
 0x134   :  { %1346 = vmatpush3.bf16.msra.mxu1 %v1486_v36  ;;  %1270 = vmatprep.mubr.f32.mxu1 %v650_v28 }
 0x135   :  { %1348 = vmatprep.subr.bf16.mxu1 %v1489_v44 }
 0x138   :  { %1350 = vmatpush3.bf16.msra.mxu1 %v1489_v44 }
 0x139   :  { %1352 = vmatprep.subr.bf16.mxu1 %v1351_v60 }
 0x13b   :  { %1271 = vmatmul.mubr.f32.vlgmr.msra.gmra.mrb[0].mxu1 %v660_v27 }
 0x13c   :  { %1354 = vmatpush3.bf16.msra.mxu1 %v1351_v60  ;;  %1281 = vmatprep.mubr.f32.mxu1 %v648_v24 }
 0x13d   :  { %1356 = vmatprep.subr.bf16.mxu1 %v1355_v61 }
 0x140   :  { %1358 = vmatpush3.bf16.msra.mxu1 %v1355_v61 }
 0x141   :  { %1360 = vmatprep.subr.bf16.mxu1 %v1486_v36 }
 0x143   :  { %1282 = vmatmul.mubr.f32.vlgmr.msra.gmra.mrb[0].mxu1 %v658_v23 }
 0x144   :  { %1362 = vmatpush3.bf16.msra.mxu1 %v1486_v36  ;;  %1292 = vmatprep.mubr.f32.mxu1 %v648_v24 }
 0x145   :  { %1364 = vmatprep.subr.bf16.mxu1 %v1489_v44 }
 0x148   :  { %1366 = vmatpush3.bf16.msra.mxu1 %v1489_v44 }
 0x14b   :  { %1293 = vmatmul.mubr.f32.vlgmr.msra.gmra.mrb[0].mxu1 %v658_v23 }
 0x206   :  { %v1239_v33 = vpop.f32.mrb[2].mxu0 }
 0x207   :  { %v654_v34 = vpop.f32.mrb[3].mxu0  ;;  %v665_v37 = vadd.f32 %v1239_v33, %v1126_v35 }
 0x208   :  { %v655_v38 = vadd.f32 %v1126_v35, %v654_v34 }
 0x21e   :  { %v1294_v39 = vpop.f32.mrb[0].mxu1 }
 0x21f   :  { %v1370_v40 = vadd.f32 %v1294_v39, %v665_v37  ;;  %v1097_v41 = vpop.f32.mrb[1].mxu1 }
 0x220   :  { %v1372_v36 = vadd.f32 %v1097_v41, %v655_v38 }
 0x221   :  { %1108 = vst.msk [vmem:[#allocation4 + $0x8] sm:$0xff] %vm39_vm0, %v1370_v40 }
 0x222   :  { %1107 = vst.msk [vmem:[#allocation4] sm:$0xff] %vm39_vm0, %v1372_v36 }
 0x223   :  { %1409 = shalt.err (!%p1406_p4)
}
 0x224   :  { %s1410_s16 = scalar_lea.hbm %s1528_s6, 256 }
 0x225   :  { %p1411_p5 = scmp.ne.s32.totalorder %s1528_s6, %s1410_s16  ;;  %p1414_p6 = scmp.lt.u32.totalorder %s1410_s16, %s1528_s6 }
 0x227   :  { %p1416_p7 = pnand %p1414_p6, %p1411_p5 }
 0x229   :  { %1419 = shalt.err (!%p1416_p7)
}
 0x22a   :  { %s1423_s21 = smov 128   ;;  %s1424_s0 = smov 8  }
 0x22b   :  { %1120 = dma.vmem_to_hbm [thread:$0]  %s1115_s13, 256, %s1528_s6, [#allocation5], %s1423_s21, %s1423_s21, %s1424_s0  }
 0x22c   :  { %1420 = dma.done.wait [#allocation5], 256  }
 0x22d   :  { %1421 = vsyncadd [#allocation5], 4294967040 }
 0x22e   :  { %1124 = vsyncpa [#allocation5], 1 }

</bundles_post_ra>
